<compile_context>
chip_gen: v7x
topology: tpu7x:2x2x1
jax: 0.10.0
libtpu: 0.0.40
codegen_flags: <defaults>
</compile_context>

<pallas_src>
import jax
import jax.numpy as jnp
from jax.experimental import pallas as pl
from jax.experimental.pallas import tpu as pltpu


_VMEM_BUDGET_BYTES = 8 * 1024 * 1024  # conservative: fits v5e 16 MiB scoped default


def make_positional_encoding(d_model: int, max_len: int = 1500) -> jnp.ndarray:
    """Deterministic sinusoidal table, identical math to the PyTorch __init__.

    Also handles odd d_model (the cos half gets floor(d_model/2) columns).
    """
    position = jnp.arange(0, max_len, dtype=jnp.float32)[:, None]          # (max_len, 1)
    div_term = jnp.exp(
        jnp.arange(0, d_model, 2, dtype=jnp.float32)
        * (-jnp.log(jnp.float32(10000.0)) / d_model)
    )                                                                       # (ceil(D/2),)
    sin_part = jnp.sin(position * div_term)                                 # (max_len, ceil(D/2))
    cos_part = jnp.cos(position * div_term)                                 # (max_len, ceil(D/2))
    enc = jnp.zeros((max_len, d_model), dtype=jnp.float32)
    enc = enc.at[:, 0::2].set(sin_part)
    enc = enc.at[:, 1::2].set(cos_part[:, : d_model // 2])
    return enc                                                              # (max_len, d_model)


# ----------------------------- kernels ------------------------------------ #

def _posenc_add3d_kernel(x_ref, enc_ref, o_ref):
    # x_ref: (tile_b, tile_s, D)   enc_ref: (tile_s, D)   o_ref: (tile_b, tile_s, D)
    # Plain VPU add; enc broadcasts over the leading (batch) axis only.
    o_ref[...] = x_ref[...] + enc_ref[...][None, :, :]


def _posenc_add2d_kernel(x_ref, enc_ref, o_ref):
    # x_ref: (B, tile_n)   enc_ref: (1, tile_n)   o_ref: (B, tile_n)
    o_ref[...] = x_ref[...] + enc_ref[...]


# --------------------------- tile planning --------------------------------- #

def _plan_3d_tiles(B: int, S: int, D: int, itemsize: int,
                   budget_bytes: int = _VMEM_BUDGET_BYTES):
    """Pick (tile_b, tile_s) for the natural-layout path.

    tile_s must be a multiple of 8 dividing S (or S itself, full extent);
    tile_b is any divisor of B (leading dim, no (8,128) constraint).  Prefer
    the full batch per block so the encoding tile is amortized over it.
    """
    s_cands = [d for d in range(S, 0, -1) if S % d == 0 and d % 8 == 0]
    if not s_cands:
        s_cands = [S]                                  # full-extent fallback
    b_cands = [d for d in range(B, 0, -1) if B % d == 0]
    for tb in b_cands:
        for ts in s_cands:
            # double-buffered: 2 bufs * (x block + out block + enc block)
            if 2 * (2 * tb + 1) * ts * D * itemsize <= budget_bytes:
                return tb, ts
    return 1, s_cands[-1]


def _pick_tile_n(n_total: int, batch: int, itemsize: int,
                 budget_bytes: int = _VMEM_BUDGET_BYTES) -> int:
    """Largest lane-dense tile (multiple of 128) dividing n_total whose
    double-buffered footprint (x + out + enc blocks, x2 buffers) fits the
    VMEM budget.  Falls back to one full-extent block if n_total % 128 != 0."""
    if n_total % 128 != 0:
        return n_total
    per_elem = 2 * (2 * batch + 1) * itemsize          # 2 bufs * (x + out + enc)
    max_tile = max(128, (budget_bytes // per_elem) // 128 * 128)
    m = n_total // 128
    best = 128
    d = 1
    while d * d <= m:
        if m % d == 0:
            for cand in (d, m // d):
                t = cand * 128
                if best < t <= max_tile:
                    best = t
        d += 1
    return best


# ------------------------------ forward ------------------------------------ #

def positional_encoding_forward(x: jnp.ndarray, encoding: jnp.ndarray) -> jnp.ndarray:
    """x: (B, S, D); encoding: (max_len, D). Returns x + encoding[:S] (broadcast over B)."""
    B, S, D = x.shape
    max_len = encoding.shape[0]
    assert S <= max_len, f"sequence length {S} exceeds max_len {max_len}"
    assert encoding.shape[1] == D, "d_model mismatch between x and encoding table"

    # Cast in the wrapper so the in-kernel add stays in x.dtype (no promotion).
    enc_slice = encoding[:S, :].astype(x.dtype)
    itemsize = jnp.dtype(x.dtype).itemsize

    if D % 128 == 0:
        # Path A: natural (B, S, D) layout -- lane-dense stores with zero
        # wrapper reshape/relayout cost.
        tile_b, tile_s = _plan_3d_tiles(B, S, D, itemsize)
        grid = (S // tile_s, B // tile_b)              # batch innermost: enc block reused
        return pl.pallas_call(
            _posenc_add3d_kernel,
            out_shape=jax.ShapeDtypeStruct((B, S, D), x.dtype),
            grid_spec=pltpu.PrefetchScalarGridSpec(
                num_scalar_prefetch=0,
                grid=grid,
                in_specs=[
                    pl.BlockSpec((tile_b, tile_s, D), lambda s, b: (b, s, 0)),  # x
                    pl.BlockSpec((tile_s, D), lambda s, b: (s, 0)),             # enc
                ],
                out_specs=pl.BlockSpec((tile_b, tile_s, D), lambda s, b: (b, s, 0)),
            ),
            compiler_params=pltpu.CompilerParams(
                dimension_semantics=("parallel", "parallel"),
            ),
        )(x, enc_slice)

    # Path B: lane-dense flatten.  Row-major reshape keeps x[b, s, d] <-> enc[s, d]
    # aligned because the encoding only broadcasts over the batch axis.
    N = S * D
    x_flat = x.reshape(B, N)
    enc_flat = enc_slice.reshape(1, N)

    tile_n = _pick_tile_n(N, B, itemsize)
    num_tiles = N // tile_n

    out_flat = pl.pallas_call(
        _posenc_add2d_kernel,
        out_shape=jax.ShapeDtypeStruct((B, N), x.dtype),
        grid_spec=pltpu.PrefetchScalarGridSpec(
            num_scalar_prefetch=0,
            grid=(num_tiles,),
            in_specs=[
                pl.BlockSpec((B, tile_n), lambda i: (0, i)),   # x tile (full batch)
                pl.BlockSpec((1, tile_n), lambda i: (0, i)),   # matching enc tile
            ],
            out_specs=pl.BlockSpec((B, tile_n), lambda i: (0, i)),
        ),
        compiler_params=pltpu.CompilerParams(
            dimension_semantics=("parallel",),
        ),
    )(x_flat, enc_flat)

    return out_flat.reshape(B, S, D)


if __name__ == "__main__":
    key = jax.random.PRNGKey(0)

    # Case 1: shapes consistent with the module defaults (hits the flatten path).
    B, S, D = 2, 8, 32
    k1, k2 = jax.random.split(key)
    x = jax.random.normal(k1, (B, S, D), dtype=jnp.float32)
    encoding = make_positional_encoding(d_model=D, max_len=1500)
    out = jax.block_until_ready(positional_encoding_forward(x, encoding))
    ref = x + encoding[None, :S, :].astype(x.dtype)
    assert out.shape == (B, S, D)
    assert jnp.allclose(out, ref, atol=1e-6), "mismatch vs reference (flatten path)"

    # Case 2: 128-aligned d_model (hits the natural-layout path).
    B2, S2, D2 = 2, 16, 128
    x2 = jax.random.normal(k2, (B2, S2, D2), dtype=jnp.float32)
    encoding2 = make_positional_encoding(d_model=D2, max_len=64)
    out2 = jax.block_until_ready(positional_encoding_forward(x2, encoding2))
    ref2 = x2 + encoding2[None, :S2, :].astype(x2.dtype)
    assert out2.shape == (B2, S2, D2)
    assert jnp.allclose(out2, ref2, atol=1e-6), "mismatch vs reference (3D path)"

    print("KERNEL_OK")
</pallas_src>

<mosaic_0001>
module attributes {stable_mosaic.version = 11 : i64} {
  func.func @_posenc_add2d_kernel(%arg0: i32, %arg1: memref<2x256xf32, #tpu.memory_space<vmem>>, %arg2: memref<1x256xf32, #tpu.memory_space<vmem>>, %arg3: memref<2x256xf32, #tpu.memory_space<vmem>>) attributes {dimension_semantics = [#tpu.dimension_semantics<parallel>], iteration_bounds = array<i64: 1>, scalar_prefetch = 0 : i64, scratch_operands = 0 : i64, tpu.core_type = #tpu.core_type<tc>, window_params = [{transform_indices = @transform_0, window_bounds = array<i64: 2, 256>}, {transform_indices = @transform_1, window_bounds = array<i64: 1, 256>}, {transform_indices = @transform_2, window_bounds = array<i64: 2, 256>}]} {
    %c0 = arith.constant 0 : index
    %c0_0 = arith.constant 0 : index
    %0 = vector.load %arg1[%c0, %c0_0] : memref<2x256xf32, #tpu.memory_space<vmem>>, vector<2x256xf32>
    %c0_1 = arith.constant 0 : index
    %c0_2 = arith.constant 0 : index
    %1 = vector.load %arg2[%c0_1, %c0_2] : memref<1x256xf32, #tpu.memory_space<vmem>>, vector<1x256xf32>
    %2 = vector.broadcast %1 : vector<1x256xf32> to vector<2x256xf32>
    %3 = arith.addf %0, %2 : vector<2x256xf32>
    %c0_3 = arith.constant 0 : index
    %c0_4 = arith.constant 0 : index
    %4 = vector.load %arg3[%c0_3, %c0_4] : memref<2x256xf32, #tpu.memory_space<vmem>>, vector<2x256xf32>
    tpu.vector_store %arg3[%c0_3, %c0_4], %3 {strides = array<i32>} : memref<2x256xf32, #tpu.memory_space<vmem>>, vector<2x256xf32>,
    return
  }
  func.func @transform_0(%arg0: i32) -> (i32, i32) {
    %c0_i32 = arith.constant 0 : i32
    %c0_i32_0 = arith.constant 0 : i32
    return %c0_i32, %arg0 : i32, i32
  }
  func.func @transform_1(%arg0: i32) -> (i32, i32) {
    %c0_i32 = arith.constant 0 : i32
    %c0_i32_0 = arith.constant 0 : i32
    return %c0_i32, %arg0 : i32, i32
  }
  func.func @transform_2(%arg0: i32) -> (i32, i32) {
    %c0_i32 = arith.constant 0 : i32
    %c0_i32_0 = arith.constant 0 : i32
    return %c0_i32, %arg0 : i32, i32
  }
}

</mosaic_0001>

<bundles_post_ra>
// kernel: tpu_custom_call.1
= control target key start
LH: loop header
LB: loop body
LE: loop exit
PB: predicated region body
PF: predicated region fallthrough
CT: control target
= control target key end

     0   :  { %7 = vsyncpa [#allocation3], 0  ;;  %s157_s0 = inlined_call_operand.hbm [shape: f32[2,256], index: 0, kind: input, shape index: {}]   ;;  %s158_s1 = inlined_call_operand.vmem [shape: f32[1,256], index: 1, kind: input, shape index: {}]   ;;  %s159_s2 = inlined_call_operand.hbm [shape: f32[2,256], index: 2, kind: output, shape index: {}]  }
   0x1   :  { %8 = vsyncpa [#allocation4], 0  ;;  %s112_s9 = smov [#allocation2]   ;;  %s64_s13 = scalar_lea.hbm %s157_s0, 64 }
   0x2   :  { %s15_s10 = sshll.u32 %s112_s9, 4  ;;  %p65_p0 = scmp.ne.s32.totalorder %s157_s0, %s64_s13  ;;  %s16_s10 = int_to_ptr.vmem [resolvable:$true] %s15_s10 }
   0x3   :  { %p68_p1 = scmp.lt.u32.totalorder %s64_s13, %s157_s0 }
   0x5   :  { %p70_p2 = pnand %p68_p1, %p65_p0 }
   0x7   :  { %73 = shalt.err (!%p70_p2)
}
   0x8   :  { %s74_s18 = scalar_lea.vmem %s16_s10, 64  ;;  %p79_p4 = scmp.lt.s32.totalorder %s16_s10, %s16_s10 }
   0x9   :  { %p75_p3 = scmp.ne.s32.totalorder %s16_s10, %s74_s18  ;;  %p80_p5 = scmp.lt.s32.totalorder %s74_s18, %s74_s18 }
   0xb   :  { %p81_p6 = por %p80_p5, %p79_p4 }
   0xd   :  { %p82_p7 = pnand %p81_p6, %p75_p3 }
   0xf   :  { %85 = shalt.err (!%p82_p7)
}
  0x10   :  { %18 = dma.hbm_to_vmem [thread:$0]  %s157_s0, 64, %s16_s10, [#allocation3]  }
  0x11   :  { %108 = dma.done.wait [#allocation3], 64  }
  0x12   :  { %109 = vsyncadd [#allocation3], 4294967232  ;;  %v27_v0 = vlaneseq  ;;  %v113_v1 = vmov 1983009808   ;;  %v25_v7 = vld [vmem:[%s158_s1] sm:$0x3] }
  0x13   :  { %v37_v2 = vunpack.c.l.s4 %v113_v1  ;;  %v24_v12 = vld [vmem:[#allocation2] sm:$0xf]  ;;  %s114_s23 = smov [#allocation5]  }
  0x14   :  { %v28_v3 = vshrl.u32 %v27_v0, 7  ;;  %s52_s0 = sshll.u32 %s114_s23, 4  ;;  %s53_s0 = int_to_ptr.vmem [resolvable:$true] %s52_s0 }
  0x15   :  { %v38_v6 = vunpack.c.0.s8 %v37_v2  ;;  %s86_s24 = scalar_lea.vmem %s53_s0, 64  ;;  %p91_p9 = scmp.lt.s32.totalorder %s53_s0, %s53_s0 }
  0x16   :  { %v29_v4 = vsub.s32 0, %v28_v3  ;;  %v33_v5 = vsub.s32 1, %v28_v3  ;;  %p87_p8 = scmp.ne.s32.totalorder %s53_s0, %s86_s24  ;;  %p92_p10 = scmp.lt.s32.totalorder %s86_s24, %s86_s24 }
  0x17   :  { %v41_v10 = vsub.s32 %v38_v6, %v28_v3 }
  0x18   :  { %v30_v8 = vrot.slane %v25_v7, %v29_v4  ;;  %v34_v9 = vrot.slane %v25_v7, %v33_v5  ;;  %p93_p11 = por %p92_p10, %p91_p9 }
  0x1a   :  { %v35_v11 = vcombine.low %v30_v8, %v34_v9  ;;  %p94_p12 = pnand %p93_p11, %p87_p8 }
  0x1c   :  { %v42_v13 = vrot.slane %v35_v11, %v41_v10 }
  0x1e   :  { %v44_v14 = vadd.f32 %v42_v13, %v24_v12 }
  0x20   :  { %45 = vst [vmem:[#allocation5] sm:$0xf] %v44_v14 }
  0x21   :  { %97 = shalt.err (!%p94_p12)
}
  0x22   :  { %s98_s26 = scalar_lea.hbm %s159_s2, 64 }
  0x23   :  { %p99_p13 = scmp.ne.s32.totalorder %s159_s2, %s98_s26  ;;  %p102_p0 = scmp.lt.u32.totalorder %s98_s26, %s159_s2 }
  0x25   :  { %p104_p1 = pnand %p102_p0, %p99_p13 }
  0x27   :  { %107 = shalt.err (!%p104_p1)
}
  0x28   :  { %55 = dma.vmem_to_hbm [thread:$0]  %s53_s0, 64, %s159_s2, [#allocation4]  }
  0x29   :  { %110 = dma.done.wait [#allocation4], 64  }
  0x2a   :  { %111 = vsyncadd [#allocation4], 4294967232 }
  0x2b   :  { %59 = vsyncpa [#allocation3], 1 }
  0x2c   :  { %60 = vsyncpa [#allocation4], 1 }

</bundles_post_ra>
